<compile_context>
chip_gen: v7x
topology: tpu7x:2x2x1
jax: 0.10.0
libtpu: 0.0.40
codegen_flags: <defaults>
</compile_context>

<pallas_src>
import jax
import jax.numpy as jnp
from jax.experimental import pallas as pl
from jax.experimental.pallas import tpu as pltpu

STATE_DIM = 150          # fixed by the hard-coded 150-element encoder buffer
ACTION_DIM = 6
SA_DIM = STATE_DIM + ACTION_DIM      # 156
HIDDEN_DIM = 256
BLOCK_B = 1024           # max batch tile (rows per grid step); multiple of 8

# The frozen `encoder` parameter from TwinQ.__init__ (150 values).
ENCODER = jnp.asarray(
    [1e-06] * 10 + [0.1] * 5 + [0.01] * 5 + [1e-04] * 5 + [1e-05] * 5 +
    [0.1] * 10 + [0.01] * 20 + [1.0] * 10 + [0.1] * 30 + [1.0] * 50,
    dtype=jnp.float32,
)
assert ENCODER.shape == (STATE_DIM,)


# ----------------------------------------------------------------------------
# Pallas kernel: fused twin-MLP for one batch tile
# ----------------------------------------------------------------------------
def _twinq_kernel(b3_ref,                      # SMEM (2,) f32: [b3_q1, b3_q2]
                  state_ref, action_ref,       # (TB,S) f32, (TB,A) f32
                  w1_ref, b1_ref,              # (S+A,2H) bf16, (1,2H) f32
                  w2a_ref, b2a_ref, w3a_ref,   # (H,H) bf16, (1,H) f32, (1,H) f32
                  w2b_ref, b2b_ref, w3b_ref,   # (H,H) bf16, (1,H) f32, (1,H) f32
                  out_ref,                     # (TB,1) f32
                  sa_ref):                     # VMEM scratch (TB, S+A) f32
    # Build the fused [state | action] tile in VMEM. All S+A columns are
    # written every grid step -> no pad-column init, safe under megacore
    # sharding of the batch axis.
    sa_ref[:, 0:STATE_DIM] = state_ref[...]
    sa_ref[:, STATE_DIM:SA_DIM] = action_ref[...]
    x = sa_ref[...].astype(jnp.bfloat16)                  # (TB, S+A) bf16

    # Layer 1 for BOTH heads in a single K=(S+A) GEMM (encoder pre-folded
    # into the state rows of w1): x @ [W1_q1 | W1_q2] -> (TB, 2H).
    h = jnp.dot(x, w1_ref[...], preferred_element_type=jnp.float32) + b1_ref[...]
    h = jnp.maximum(h, 0.0)                               # ReLU
    h1 = h[:, :HIDDEN_DIM].astype(jnp.bfloat16)           # lane-aligned slice @256
    h2 = h[:, HIDDEN_DIM:].astype(jnp.bfloat16)

    def tail(hh, w2_ref, b2_ref, w3_ref, b3):
        g = jnp.dot(hh, w2_ref[...], preferred_element_type=jnp.float32) + b2_ref[...]
        g = jnp.maximum(g, 0.0)                           # ReLU
        # Output Linear(H, 1): VPU multiply + XLU lane-reduce (no N=1 MXU pass).
        return jnp.sum(g * w3_ref[...], axis=-1, keepdims=True) + b3

    q1 = tail(h1, w2a_ref, b2a_ref, w3a_ref, b3_ref[0])
    q2 = tail(h2, w2b_ref, b2b_ref, w3b_ref, b3_ref[1])
    out_ref[...] = jnp.minimum(q1, q2)                    # (TB, 1)


# ----------------------------------------------------------------------------
# Parameter packing (hoisted: call once per parameter update, not per forward)
# ----------------------------------------------------------------------------
def pack_params(q1_params, q2_params):
    """Fold encoder into W1 state rows, fuse state/action along K and the two
    heads along N, cast matmul weights to bf16."""
    (w1s1, w1a1, b11, w21, b21, w31, b31) = q1_params
    (w1s2, w1a2, b12, w22, b22, w32, b32) = q2_params
    enc = ENCODER[:, None]                                           # (S, 1)
    w1_h1 = jnp.concatenate([enc * w1s1, w1a1], axis=0)              # (S+A, H)
    w1_h2 = jnp.concatenate([enc * w1s2, w1a2], axis=0)              # (S+A, H)
    w1 = jnp.concatenate([w1_h1, w1_h2], axis=1).astype(jnp.bfloat16)  # (S+A, 2H)
    b1 = jnp.concatenate([b11, b12], axis=1)                         # (1, 2H) f32
    w2a = w21.astype(jnp.bfloat16)
    w2b = w22.astype(jnp.bfloat16)
    w3a = w31.reshape(1, HIDDEN_DIM)                                 # (1, H) f32
    w3b = w32.reshape(1, HIDDEN_DIM)
    b3 = jnp.concatenate([b31.reshape(-1), b32.reshape(-1)])         # (2,) f32
    return (b3, w1, b1, w2a, b21, w3a, w2b, b22, w3b)


# ----------------------------------------------------------------------------
# Wrapper
# ----------------------------------------------------------------------------
def _round_up(x, m):
    return ((x + m - 1) // m) * m


def _choose_tile(B):
    """Batch tile: multiple of 8, capped at BLOCK_B, split into >=2 grid tiles
    whenever possible so both v7x TensorCores get work."""
    if B <= 8:
        return B                       # full-dim block (single tiny tile)
    return min(BLOCK_B, _round_up(pl.cdiv(B, 2), 8))


@jax.jit
def twinq_forward(state, action, packed_params):
    """Pallas-backed TwinQ forward. Returns shape (B,) float32."""
    b3, w1, b1, w2a, b2a, w3a, w2b, b2b, w3b = packed_params
    B = state.shape[0]
    TB = _choose_tile(B)
    grid = (pl.cdiv(B, TB),)
    H, H2 = HIDDEN_DIM, 2 * HIDDEN_DIM

    batch = lambda i: (i, 0)     # batch-tiled operands
    const = lambda i: (0, 0)     # VMEM-resident weights / biases

    in_specs = [
        pl.BlockSpec(memory_space=pltpu.MemorySpace.SMEM),        # b3 scalars
        pl.BlockSpec((TB, STATE_DIM), batch),                     # state
        pl.BlockSpec((TB, ACTION_DIM), batch),                    # action
        pl.BlockSpec((SA_DIM, H2), const),                        # W1 (K- and N-fused)
        pl.BlockSpec((1, H2), const),                             # b1 (fused)
        pl.BlockSpec((H, H), const),                              # W2  head 1
        pl.BlockSpec((1, H), const),                              # b2  head 1
        pl.BlockSpec((1, H), const),                              # w3  head 1 (row)
        pl.BlockSpec((H, H), const),                              # W2  head 2
        pl.BlockSpec((1, H), const),                              # b2  head 2
        pl.BlockSpec((1, H), const),                              # w3  head 2 (row)
    ]
    out_spec = pl.BlockSpec((TB, 1), batch)
    # NOTE: the (TB,1) store is the only narrow store left; its masked vst
    # cost hides under the MXU work, so the extra in-kernel transpose a
    # lane-dense (1,TB) output would require is not worth it here.

    flops = 2 * B * (SA_DIM * H2 + 2 * H * H + 2 * H)
    weight_bytes = ((w1.size + w2a.size + w2b.size) * 2
                    + (b1.size + b2a.size + b2b.size
                       + w3a.size + w3b.size + b3.size) * 4)
    bytes_accessed = B * (SA_DIM + 1) * 4 + weight_bytes

    out = pl.pallas_call(
        _twinq_kernel,
        out_shape=jax.ShapeDtypeStruct((B, 1), jnp.float32),
        grid=grid,
        in_specs=in_specs,
        out_specs=out_spec,
        scratch_shapes=[pltpu.VMEM((TB, SA_DIM), jnp.float32)],
        compiler_params=pltpu.CompilerParams(
            dimension_semantics=("parallel",)),
        cost_estimate=pl.CostEstimate(
            flops=flops, transcendentals=0, bytes_accessed=bytes_accessed),
    )(b3, state, action, w1, b1, w2a, b2a, w3a, w2b, b2b, w3b)
    return out[:, 0]   # Squeeze(-1)


# ----------------------------------------------------------------------------
# Deterministic parameter init (mirrors nn.Linear's U(-1/sqrt(fan_in), ...))
# ----------------------------------------------------------------------------
def _linear_init(key, fan_in, fan_out):
    kw, kb = jax.random.split(key)
    bound = 1.0 / jnp.sqrt(jnp.float32(fan_in))
    w = jax.random.uniform(kw, (fan_in, fan_out), jnp.float32, -bound, bound)
    b = jax.random.uniform(kb, (1, fan_out), jnp.float32, -bound, bound)
    return w, b


def make_head_params(key):
    k1, k2, k3 = jax.random.split(key, 3)
    in_dim = STATE_DIM + ACTION_DIM
    w1, b1 = _linear_init(k1, in_dim, HIDDEN_DIM)
    w2, b2 = _linear_init(k2, HIDDEN_DIM, HIDDEN_DIM)
    w3, b3 = _linear_init(k3, HIDDEN_DIM, 1)
    # split first-layer weight into state / action parts (original layout)
    return (w1[:STATE_DIM, :], w1[STATE_DIM:, :], b1, w2, b2, w3, b3)


# Pure-JAX f32 reference for correctness checking (original semantics).
def twinq_reference(state, action, q1_params, q2_params):
    s = state * ENCODER[None, :]

    def head(p):
        w1s, w1a, b1, w2, b2, w3, b3 = p
        h = jnp.maximum(s @ w1s + action @ w1a + b1, 0.0)
        h = jnp.maximum(h @ w2 + b2, 0.0)
        return (h @ w3 + b3)[:, 0]

    return jnp.minimum(head(q1_params), head(q2_params))


if __name__ == "__main__":
    key = jax.random.PRNGKey(0)
    k_data, k_q1, k_q2 = jax.random.split(key, 3)

    q1_params = make_head_params(k_q1)
    q2_params = make_head_params(k_q2)

    # Pack ONCE (hoisted out of the per-call forward path).
    packed = jax.block_until_ready(pack_params(q1_params, q2_params))

    # B=2: tiny single tile; B=256: two exact tiles; B=1000: partial last tile.
    for B in (2, 256, 1000):
        ks, ka = jax.random.split(jax.random.fold_in(k_data, B))
        state = jax.random.normal(ks, (B, STATE_DIM), jnp.float32)
        action = jax.random.normal(ka, (B, ACTION_DIM), jnp.float32)

        out = twinq_forward(state, action, packed)
        out = jax.block_until_ready(out)

        ref = twinq_reference(state, action, q1_params, q2_params)
        assert out.shape == (B,)
        max_err = float(jnp.max(jnp.abs(out - ref)))
        # bf16 matmul inputs (f32 accumulation) -> loosened tolerance vs f32 ref
        assert max_err < 5e-2, (B, max_err)

    print("KERNEL_OK")
</pallas_src>

<mosaic_0001>
module attributes {stable_mosaic.version = 11 : i64} {
  func.func @_twinq_kernel(%arg0: i32, %arg1: memref<2xf32, #tpu.memory_space<smem>>, %arg2: memref<2x150xf32, #tpu.memory_space<vmem>>, %arg3: memref<2x6xf32, #tpu.memory_space<vmem>>, %arg4: memref<156x512xbf16, #tpu.memory_space<vmem>>, %arg5: memref<1x512xf32, #tpu.memory_space<vmem>>, %arg6: memref<256x256xbf16, #tpu.memory_space<vmem>>, %arg7: memref<1x256xf32, #tpu.memory_space<vmem>>, %arg8: memref<1x256xf32, #tpu.memory_space<vmem>>, %arg9: memref<256x256xbf16, #tpu.memory_space<vmem>>, %arg10: memref<1x256xf32, #tpu.memory_space<vmem>>, %arg11: memref<1x256xf32, #tpu.memory_space<vmem>>, %arg12: memref<2x1xf32, #tpu.memory_space<vmem>>, %arg13: memref<2x156xf32, #tpu.memory_space<vmem>>) attributes {dimension_semantics = [#tpu.dimension_semantics<parallel>], iteration_bounds = array<i64: 1>, scalar_prefetch = 0 : i64, scratch_operands = 1 : i64, tpu.core_type = #tpu.core_type<tc>, window_params = [{transform_indices = @transform_0, window_bounds = array<i64: 2>}, {transform_indices = @transform_1, window_bounds = array<i64: 2, 150>}, {transform_indices = @transform_2, window_bounds = array<i64: 2, 6>}, {pipeline_mode = #tpu.pipeline_mode<synchronous>, transform_indices = @transform_3, window_bounds = array<i64: 156, 512>}, {pipeline_mode = #tpu.pipeline_mode<synchronous>, transform_indices = @transform_4, window_bounds = array<i64: 1, 512>}, {pipeline_mode = #tpu.pipeline_mode<synchronous>, transform_indices = @transform_5, window_bounds = array<i64: 256, 256>}, {pipeline_mode = #tpu.pipeline_mode<synchronous>, transform_indices = @transform_6, window_bounds = array<i64: 1, 256>}, {pipeline_mode = #tpu.pipeline_mode<synchronous>, transform_indices = @transform_7, window_bounds = array<i64: 1, 256>}, {pipeline_mode = #tpu.pipeline_mode<synchronous>, transform_indices = @transform_8, window_bounds = array<i64: 256, 256>}, {pipeline_mode = #tpu.pipeline_mode<synchronous>, transform_indices = @transform_9, window_bounds = array<i64: 1, 256>}, {pipeline_mode = #tpu.pipeline_mode<synchronous>, transform_indices = @transform_10, window_bounds = array<i64: 1, 256>}, {transform_indices = @transform_11, window_bounds = array<i64: 2, 1>}]} {
    %c0 = arith.constant 0 : index
    %c0_0 = arith.constant 0 : index
    %0 = vector.load %arg2[%c0, %c0_0] : memref<2x150xf32, #tpu.memory_space<vmem>>, vector<2x150xf32>
    %c0_1 = arith.constant 0 : index
    %c0_2 = arith.constant 0 : index
    %1 = vector.load %arg13[%c0_1, %c0_2] : memref<2x156xf32, #tpu.memory_space<vmem>>, vector<2x150xf32>
    tpu.vector_store %arg13[%c0_1, %c0_2], %0 {strides = array<i32>} : memref<2x156xf32, #tpu.memory_space<vmem>>, vector<2x150xf32>,
    %c0_3 = arith.constant 0 : index
    %c0_4 = arith.constant 0 : index
    %2 = vector.load %arg3[%c0_3, %c0_4] : memref<2x6xf32, #tpu.memory_space<vmem>>, vector<2x6xf32>
    %c0_5 = arith.constant 0 : index
    %c150 = arith.constant 150 : index
    %3 = vector.load %arg13[%c0_5, %c150] : memref<2x156xf32, #tpu.memory_space<vmem>>, vector<2x6xf32>
    tpu.vector_store %arg13[%c0_5, %c150], %2 {strides = array<i32>} : memref<2x156xf32, #tpu.memory_space<vmem>>, vector<2x6xf32>,
    %c0_6 = arith.constant 0 : index
    %c0_7 = arith.constant 0 : index
    %4 = vector.load %arg13[%c0_6, %c0_7] : memref<2x156xf32, #tpu.memory_space<vmem>>, vector<2x156xf32>
    %5 = arith.truncf %4 : vector<2x156xf32> to vector<2x156xbf16>
    %c0_8 = arith.constant 0 : index
    %c0_9 = arith.constant 0 : index
    %6 = vector.load %arg4[%c0_8, %c0_9] : memref<156x512xbf16, #tpu.memory_space<vmem>>, vector<156x512xbf16>
    %cst = arith.constant dense<0.000000e+00> : vector<2x512xf32>
    %7 = tpu.matmul %5, %6, %cst {dimension_numbers = #tpu.dot_dimension_numbers<[1], [0], [0], [1], [0, 0, 1, 1], [], []>} : vector<2x156xbf16>, vector<156x512xbf16>, vector<2x512xf32> -> vector<2x512xf32>
    %c0_10 = arith.constant 0 : index
    %c0_11 = arith.constant 0 : index
    %8 = vector.load %arg5[%c0_10, %c0_11] : memref<1x512xf32, #tpu.memory_space<vmem>>, vector<1x512xf32>
    %9 = vector.broadcast %8 : vector<1x512xf32> to vector<2x512xf32>
    %10 = arith.addf %7, %9 : vector<2x512xf32>
    %cst_12 = arith.constant 0.000000e+00 : f32
    %11 = vector.broadcast %cst_12 : f32 to vector<2x512xf32>
    %12 = arith.maximumf %10, %11 : vector<2x512xf32>
    %13 = vector.extract_strided_slice %12 {offsets = [0, 0], sizes = [2, 256], strides = [1, 1]} : vector<2x512xf32> to vector<2x256xf32>
    %14 = arith.truncf %13 : vector<2x256xf32> to vector<2x256xbf16>
    %15 = vector.extract_strided_slice %12 {offsets = [0, 256], sizes = [2, 256], strides = [1, 1]} : vector<2x512xf32> to vector<2x256xf32>
    %16 = arith.truncf %15 : vector<2x256xf32> to vector<2x256xbf16>
    %c0_13 = arith.constant 0 : index
    %17 = memref.load %arg1[%c0_13] : memref<2xf32, #tpu.memory_space<smem>>
    %c0_14 = arith.constant 0 : index
    %c0_15 = arith.constant 0 : index
    %18 = vector.load %arg6[%c0_14, %c0_15] : memref<256x256xbf16, #tpu.memory_space<vmem>>, vector<256x256xbf16>
    %cst_16 = arith.constant dense<0.000000e+00> : vector<2x256xf32>
    %19 = tpu.matmul %14, %18, %cst_16 {dimension_numbers = #tpu.dot_dimension_numbers<[1], [0], [0], [1], [0, 0, 1, 1], [], []>} : vector<2x256xbf16>, vector<256x256xbf16>, vector<2x256xf32> -> vector<2x256xf32>
    %c0_17 = arith.constant 0 : index
    %c0_18 = arith.constant 0 : index
    %20 = vector.load %arg7[%c0_17, %c0_18] : memref<1x256xf32, #tpu.memory_space<vmem>>, vector<1x256xf32>
    %21 = vector.broadcast %20 : vector<1x256xf32> to vector<2x256xf32>
    %22 = arith.addf %19, %21 : vector<2x256xf32>
    %cst_19 = arith.constant 0.000000e+00 : f32
    %23 = vector.broadcast %cst_19 : f32 to vector<2x256xf32>
    %24 = arith.maximumf %22, %23 : vector<2x256xf32>
    %c0_20 = arith.constant 0 : index
    %c0_21 = arith.constant 0 : index
    %25 = vector.load %arg8[%c0_20, %c0_21] : memref<1x256xf32, #tpu.memory_space<vmem>>, vector<1x256xf32>
    %26 = vector.broadcast %25 : vector<1x256xf32> to vector<2x256xf32>
    %27 = arith.mulf %24, %26 : vector<2x256xf32>
    %cst_22 = arith.constant dense<0.000000e+00> : vector<2xf32>
    %28 = vector.multi_reduction <add>, %27, %cst_22 [1] : vector<2x256xf32> to vector<2xf32>
    %29 = vector.shape_cast %28 : vector<2xf32> to vector<2x1xf32>
    %30 = vector.broadcast %17 : f32 to vector<2x1xf32>
    %31 = arith.addf %29, %30 : vector<2x1xf32>
    %c1 = arith.constant 1 : index
    %32 = memref.load %arg1[%c1] : memref<2xf32, #tpu.memory_space<smem>>
    %c0_23 = arith.constant 0 : index
    %c0_24 = arith.constant 0 : index
    %33 = vector.load %arg9[%c0_23, %c0_24] : memref<256x256xbf16, #tpu.memory_space<vmem>>, vector<256x256xbf16>
    %cst_25 = arith.constant dense<0.000000e+00> : vector<2x256xf32>
    %34 = tpu.matmul %16, %33, %cst_25 {dimension_numbers = #tpu.dot_dimension_numbers<[1], [0], [0], [1], [0, 0, 1, 1], [], []>} : vector<2x256xbf16>, vector<256x256xbf16>, vector<2x256xf32> -> vector<2x256xf32>
    %c0_26 = arith.constant 0 : index
    %c0_27 = arith.constant 0 : index
    %35 = vector.load %arg10[%c0_26, %c0_27] : memref<1x256xf32, #tpu.memory_space<vmem>>, vector<1x256xf32>
    %36 = vector.broadcast %35 : vector<1x256xf32> to vector<2x256xf32>
    %37 = arith.addf %34, %36 : vector<2x256xf32>
    %cst_28 = arith.constant 0.000000e+00 : f32
    %38 = vector.broadcast %cst_28 : f32 to vector<2x256xf32>
    %39 = arith.maximumf %37, %38 : vector<2x256xf32>
    %c0_29 = arith.constant 0 : index
    %c0_30 = arith.constant 0 : index
    %40 = vector.load %arg11[%c0_29, %c0_30] : memref<1x256xf32, #tpu.memory_space<vmem>>, vector<1x256xf32>
    %41 = vector.broadcast %40 : vector<1x256xf32> to vector<2x256xf32>
    %42 = arith.mulf %39, %41 : vector<2x256xf32>
    %cst_31 = arith.constant dense<0.000000e+00> : vector<2xf32>
    %43 = vector.multi_reduction <add>, %42, %cst_31 [1] : vector<2x256xf32> to vector<2xf32>
    %44 = vector.shape_cast %43 : vector<2xf32> to vector<2x1xf32>
    %45 = vector.broadcast %32 : f32 to vector<2x1xf32>
    %46 = arith.addf %44, %45 : vector<2x1xf32>
    %47 = arith.minimumf %31, %46 : vector<2x1xf32>
    %c0_32 = arith.constant 0 : index
    %c0_33 = arith.constant 0 : index
    %48 = vector.load %arg12[%c0_32, %c0_33] : memref<2x1xf32, #tpu.memory_space<vmem>>, vector<2x1xf32>
    tpu.vector_store %arg12[%c0_32, %c0_33], %47 {strides = array<i32>} : memref<2x1xf32, #tpu.memory_space<vmem>>, vector<2x1xf32>,
    return
  }
  func.func @transform_0(%arg0: i32) -> i32 {
    %c0_i32 = arith.constant 0 : i32
    %c0_i32_0 = arith.constant 0 : i32
    return %c0_i32 : i32
  }
  func.func @transform_1(%arg0: i32) -> (i32, i32) {
    %c0_i32 = arith.constant 0 : i32
    %c0_i32_0 = arith.constant 0 : i32
    return %arg0, %c0_i32 : i32, i32
  }
  func.func @transform_2(%arg0: i32) -> (i32, i32) {
    %c0_i32 = arith.constant 0 : i32
    %c0_i32_0 = arith.constant 0 : i32
    return %arg0, %c0_i32 : i32, i32
  }
  func.func @transform_3(%arg0: i32) -> (i32, i32) {
    %c0_i32 = arith.constant 0 : i32
    %c0_i32_0 = arith.constant 0 : i32
    %c0_i32_1 = arith.constant 0 : i32
    return %c0_i32, %c0_i32_0 : i32, i32
  }
  func.func @transform_4(%arg0: i32) -> (i32, i32) {
    %c0_i32 = arith.constant 0 : i32
    %c0_i32_0 = arith.constant 0 : i32
    %c0_i32_1 = arith.constant 0 : i32
    return %c0_i32, %c0_i32_0 : i32, i32
  }
  func.func @transform_5(%arg0: i32) -> (i32, i32) {
    %c0_i32 = arith.constant 0 : i32
    %c0_i32_0 = arith.constant 0 : i32
    %c0_i32_1 = arith.constant 0 : i32
    return %c0_i32, %c0_i32_0 : i32, i32
  }
  func.func @transform_6(%arg0: i32) -> (i32, i32) {
    %c0_i32 = arith.constant 0 : i32
    %c0_i32_0 = arith.constant 0 : i32
    %c0_i32_1 = arith.constant 0 : i32
    return %c0_i32, %c0_i32_0 : i32, i32
  }
  func.func @transform_7(%arg0: i32) -> (i32, i32) {
    %c0_i32 = arith.constant 0 : i32
    %c0_i32_0 = arith.constant 0 : i32
    %c0_i32_1 = arith.constant 0 : i32
    return %c0_i32, %c0_i32_0 : i32, i32
  }
  func.func @transform_8(%arg0: i32) -> (i32, i32) {
    %c0_i32 = arith.constant 0 : i32
    %c0_i32_0 = arith.constant 0 : i32
    %c0_i32_1 = arith.constant 0 : i32
    return %c0_i32, %c0_i32_0 : i32, i32
  }
  func.func @transform_9(%arg0: i32) -> (i32, i32) {
    %c0_i32 = arith.constant 0 : i32
    %c0_i32_0 = arith.constant 0 : i32
    %c0_i32_1 = arith.constant 0 : i32
    return %c0_i32, %c0_i32_0 : i32, i32
  }
  func.func @transform_10(%arg0: i32) -> (i32, i32) {
    %c0_i32 = arith.constant 0 : i32
    %c0_i32_0 = arith.constant 0 : i32
    %c0_i32_1 = arith.constant 0 : i32
    return %c0_i32, %c0_i32_0 : i32, i32
  }
  func.func @transform_11(%arg0: i32) -> (i32, i32) {
    %c0_i32 = arith.constant 0 : i32
    %c0_i32_0 = arith.constant 0 : i32
    return %arg0, %c0_i32 : i32, i32
  }
}

</mosaic_0001>

<bundles_post_ra>
// kernel: twinq_forward.1
= control target key start
LH: loop header
LB: loop body
LE: loop exit
PB: predicated region body
PF: predicated region fallthrough
CT: control target
= control target key end

     0   :  { %16 = vsyncpa [#allocation5], 0  ;;  %s1598_s0 = inlined_call_operand.vmem [shape: f32[2], index: 0, kind: input, shape index: {}]   ;;  %s1599_s1 = inlined_call_operand.hbm [shape: f32[2,150], index: 1, kind: input, shape index: {}]   ;;  %s1600_s2 = inlined_call_operand.vmem [shape: f32[2,6], index: 2, kind: input, shape index: {}]   ;;  %s1601_s3 = inlined_call_operand.hbm [shape: bf16[156,512], index: 3, kind: input, shape index: {}]   ;;  %s1602_s4 = inlined_call_operand.vmem [shape: f32[1,512], index: 4, kind: input, shape index: {}]   ;;  %s1603_s5 = inlined_call_operand.hbm [shape: bf16[256,256], index: 5, kind: input, shape index: {}]   ;;  %s1604_s6 = inlined_call_operand.vmem [shape: f32[1,256], index: 6, kind: input, shape index: {}]   ;;  %s1605_s7 = inlined_call_operand.vmem [shape: f32[1,256], index: 7, kind: input, shape index: {}]   ;;  %s1606_s8 = inlined_call_operand.hbm [shape: bf16[256,256], index: 8, kind: input, shape index: {}]   ;;  %s1607_s9 = inlined_call_operand.vmem [shape: f32[1,256], index: 9, kind: input, shape index: {}]   ;;  %s1608_s10 = inlined_call_operand.vmem [shape: f32[1,256], index: 10, kind: input, shape index: {}]   ;;  %s1609_s11 = inlined_call_operand.vmem [shape: f32[2,1], index: 11, kind: output, shape index: {}]  }
   0x1   :  { %17 = vsyncpa [#allocation4], 0 }
   0x2   :  { %18 = vsyncpa [#allocation8], 0 }
   0x3   :  { %19 = vsyncpa [#allocation11], 0  ;;  %s1437_s17 = smov [#allocation7]   ;;  %s26_s21 = sshll.u32 %s1598_s0, 4  ;;  %s27_s21 = int_to_ptr.vmem [resolvable:$true] %s26_s21 }
   0x4   :  { %s47_s18 = sshll.u32 %s1437_s17, 4  ;;  %s1329_s24 = scalar_lea.hbm %s1601_s3, 5120  ;;  %s48_s18 = int_to_ptr.vmem [resolvable:$true] %s47_s18 }
   0x5   :  { %p1330_p0 = scmp.ne.s32.totalorder %s1601_s3, %s1329_s24  ;;  %p1333_p1 = scmp.lt.u32.totalorder %s1329_s24, %s1601_s3 }
   0x7   :  { %p1335_p2 = pnand %p1333_p1, %p1330_p0 }
   0x9   :  { %1338 = shalt.err (!%p1335_p2)
}
   0xa   :  { %s1339_s29 = scalar_lea.vmem %s48_s18, 5120  ;;  %p1344_p4 = scmp.lt.s32.totalorder %s48_s18, %s48_s18 }
   0xb   :  { %p1340_p3 = scmp.ne.s32.totalorder %s48_s18, %s1339_s29  ;;  %p1345_p5 = scmp.lt.s32.totalorder %s1339_s29, %s1339_s29 }
   0xd   :  { %p1346_p6 = por %p1345_p5, %p1344_p4 }
   0xf   :  { %p1347_p7 = pnand %p1346_p6, %p1340_p3 }
  0x11   :  { %1350 = shalt.err (!%p1347_p7)
}
  0x12   :  { %s1438_s0 = smov 256   ;;  %s1439_s30 = smov 16  }
  0x13   :  { %53 = dma.hbm_to_vmem [thread:$0]  %s1601_s3, 5120, %s48_s18, [#allocation8], %s1438_s0, %s1438_s0, %s1439_s30  }
  0x14   :  { %s1351_s14 = scalar_lea.vmem %s27_s21, 16  ;;  %p1356_p9 = scmp.lt.s32.totalorder %s27_s21, %s27_s21 }
  0x15   :  { %p1352_p8 = scmp.ne.s32.totalorder %s27_s21, %s1351_s14  ;;  %p1357_p10 = scmp.lt.s32.totalorder %s1351_s14, %s1351_s14 }
  0x17   :  { %p1358_p11 = por %p1357_p10, %p1356_p9 }
  0x19   :  { %p1359_p12 = pnand %p1358_p11, %p1352_p8 }
  0x1b   :  { %1362 = shalt.err (!%p1359_p12)
}
  0x1c   :  { %s1440_s15 = smov [#allocation3]   ;;  %s1441_s16 = smov [#allocation6]  }
  0x1d   :  { %29 = dma.vmem_to_smem %s27_s21, 16, %s1440_s15, [#allocation5]  }
  0x1e   :  { %s36_s17 = sshll.u32 %s1441_s16, 4  ;;  %s1442_s19 = smov [#allocation9]   ;;  %s37_s17 = int_to_ptr.vmem [resolvable:$true] %s36_s17 }
  0x1f   :  { %s61_s20 = sshll.u32 %s1442_s19, 4  ;;  %s1363_s3 = scalar_lea.hbm %s1599_s1, 64  ;;  %s1522_s20 = int_to_ptr.vmem [resolvable:$true] %s61_s20 }
  0x20   :  { %p1364_p13 = scmp.ne.s32.totalorder %s1599_s1, %s1363_s3  ;;  %p1367_p0 = scmp.lt.u32.totalorder %s1363_s3, %s1599_s1 }
  0x22   :  { %p1369_p1 = pnand %p1367_p0, %p1364_p13 }
  0x24   :  { %1372 = shalt.err (!%p1369_p1)
}
  0x25   :  { %s1373_s21 = scalar_lea.vmem %s37_s17, 64  ;;  %p1378_p3 = scmp.lt.s32.totalorder %s37_s17, %s37_s17 }
  0x26   :  { %p1374_p2 = scmp.ne.s32.totalorder %s37_s17, %s1373_s21  ;;  %p1379_p4 = scmp.lt.s32.totalorder %s1373_s21, %s1373_s21 }
  0x28   :  { %p1380_p5 = por %p1379_p4, %p1378_p3 }
  0x2a   :  { %p1381_p6 = pnand %p1380_p5, %p1374_p2 }
  0x2c   :  { %1384 = shalt.err (!%p1381_p6)
}
  0x2d   :  { %39 = dma.hbm_to_vmem [thread:$0]  %s1599_s1, 64, %s37_s17, [#allocation4]  }
  0x2e   :  { %s1385_s30 = scalar_lea.hbm %s1603_s5, 4096 }
  0x2f   :  { %p1386_p7 = scmp.ne.s32.totalorder %s1603_s5, %s1385_s30  ;;  %p1389_p8 = scmp.lt.u32.totalorder %s1385_s30, %s1603_s5 }
  0x31   :  { %p1391_p9 = pnand %p1389_p8, %p1386_p7 }
  0x33   :  { %1394 = shalt.err (!%p1391_p9)
}
  0x34   :  { %s1395_s16 = scalar_lea.vmem %s1522_s20, 4096  ;;  %p1400_p11 = scmp.lt.s32.totalorder %s1522_s20, %s1522_s20 }
  0x35   :  { %p1396_p10 = scmp.ne.s32.totalorder %s1522_s20, %s1395_s16  ;;  %p1401_p12 = scmp.lt.s32.totalorder %s1395_s16, %s1395_s16 }
  0x37   :  { %p1402_p13 = por %p1401_p12, %p1400_p11 }
  0x39   :  { %p1403_p0 = pnand %p1402_p13, %p1396_p10 }
  0x3b   :  { %1406 = shalt.err (!%p1403_p0)
}
  0x3c   :  { %s1443_s1 = smov 128   ;;  %s1444_s17 = smov 8  }
  0x3d   :  { %67 = dma.hbm_to_vmem [thread:$0]  %s1603_s5, 4096, %s1522_s20, [#allocation8], %s1443_s1, %s1443_s1, %s1444_s17  }
  0x3e   :  { %s1445_s23 = smov [#allocation10]   ;;  %s1407_s25 = scalar_lea.hbm %s1606_s8, 4096 }
  0x3f   :  { %s77_s3 = sshll.u32 %s1445_s23, 4  ;;  %p1408_p1 = scmp.ne.s32.totalorder %s1606_s8, %s1407_s25  ;;  %s78_s3 = int_to_ptr.vmem [resolvable:$true] %s77_s3 }
  0x40   :  { %p1411_p2 = scmp.lt.u32.totalorder %s1407_s25, %s1606_s8 }
  0x42   :  { %p1413_p3 = pnand %p1411_p2, %p1408_p1 }
  0x44   :  { %1416 = shalt.err (!%p1413_p3)
}
  0x45   :  { %s1417_s29 = scalar_lea.vmem %s78_s3, 4096  ;;  %p1422_p5 = scmp.lt.s32.totalorder %s78_s3, %s78_s3 }
  0x46   :  { %p1418_p4 = scmp.ne.s32.totalorder %s78_s3, %s1417_s29  ;;  %p1423_p6 = scmp.lt.s32.totalorder %s1417_s29, %s1417_s29 }
  0x48   :  { %p1424_p7 = por %p1423_p6, %p1422_p5 }
  0x4a   :  { %p1425_p8 = pnand %p1424_p7, %p1418_p4 }
  0x4c   :  { %1428 = shalt.err (!%p1425_p8)
}
  0x4d   :  { %83 = dma.hbm_to_vmem [thread:$0]  %s1606_s8, 4096, %s78_s3, [#allocation11], %s1443_s1, %s1443_s1, %s1444_s17  }
  0x4e   :  { %1429 = dma.done.wait [#allocation5], 16  }
  0x4f   :  { %1430 = vsyncadd [#allocation5], 4294967280 }
  0x50   :  { %1431 = dma.done.wait [#allocation4], 64  }
  0x51   :  { %1432 = vsyncadd [#allocation4], 4294967232 }
  0x52   :  { %1433 = dma.done.wait [#allocation8], 9216  }
  0x53   :  { %1434 = vsyncadd [#allocation8], 4294958080 }
  0x54   :  { %1435 = dma.done.wait [#allocation11], 4096  }
  0x55   :  { %1436 = vsyncadd [#allocation11], 4294963200 }
  0x56   :  { %103 = sfence }
  0x57   :  { %v1052_v0 = vld.sshfl [vmem:[%s1600_s2] sm:$0x3 pattern:$0x76325410]  ;;  %s1446_s12 = smov 22   ;;  %vm106_vm0 = vcmask 1041408  }
  0x58   :  { %119 = vrot.lane.b32.xlu0 %v1052_v0, %s1446_s12  ;;  %v1173_v1 = vld [vmem:[#allocation7 + $0x4] ss:$16 sps:$4 sm:$0xff]   ;;  %v1175_v2 = vld [vmem:[#allocation7 + $0xc] ss:$16 sps:$4 sm:$0xff]   ;;  %v1177_v3 = vld [vmem:[#allocation7] ss:$16 sps:$4 sm:$0xff]  }
  0x59   :  { %413 = vmatprep.subr.bf16.mxu0 %v1173_v1  ;;  %v1178_v4 = vld [vmem:[#allocation7 + $0x8] ss:$16 sps:$4 sm:$0xff]   ;;  %454 = vmatprep.subr.bf16.mxu1 %v1175_v2  ;;  %v1179_v5 = vld [vmem:[#allocation7 + $0x24] ss:$16 sps:$4 sm:$0xff]   ;;  %v1181_v6 = vld [vmem:[#allocation7 + $0x2c] ss:$16 sps:$4 sm:$0xff]  }
  0x5a   :  { %414 = vmatpush1.bf16.msra.mxu0 %v1177_v3  ;;  %455 = vmatpush1.bf16.msra.mxu1 %v1178_v4  ;;  %v1183_v7 = vld [vmem:[#allocation7 + $0x20] ss:$16 sps:$4 sm:$0xff]   ;;  %v1184_v8 = vld [vmem:[#allocation7 + $0x28] ss:$16 sps:$4 sm:$0xff]   ;;  %v1185_v9 = vld [vmem:[#allocation7 + $0x44] ss:$16 sps:$4 sm:$0xff]  }
  0x5b   :  { %415 = vmatprep.subr.bf16.mxu0 %v1179_v5  ;;  %456 = vmatprep.subr.bf16.mxu1 %v1181_v6  ;;  %v1187_v10 = vld [vmem:[#allocation7 + $0x4c] ss:$16 sps:$4 sm:$0xff]   ;;  %v1189_v11 = vld [vmem:[#allocation7 + $0x40] ss:$16 sps:$4 sm:$0xff]   ;;  %v1190_v12 = vld [vmem:[#allocation7 + $0x48] ss:$16 sps:$4 sm:$0xff]  }
  0x5c   :  { %v1191_v13 = vld [vmem:[#allocation7 + $0x64] ss:$16 sps:$4 sm:$0xff]   ;;  %v1193_v14 = vld [vmem:[#allocation7 + $0x6c] ss:$16 sps:$4 sm:$0xff]   ;;  %v1195_v15 = vld [vmem:[#allocation7 + $0x60] ss:$16 sps:$4 sm:$0xff]  }
  0x5d   :  { %v1196_v16 = vld [vmem:[#allocation7 + $0x68] ss:$16 sps:$4 sm:$0xff]   ;;  %v1197_v17 = vld [vmem:[#allocation7 + $0x84] ss:$16 sps:$4 sm:$0xff]   ;;  %v1199_v18 = vld [vmem:[#allocation7 + $0x8c] ss:$16 sps:$4 sm:$0xff]  }
  0x5e   :  { %416 = vmatpush1.bf16.msra.mxu0 %v1183_v7  ;;  %457 = vmatpush1.bf16.msra.mxu1 %v1184_v8  ;;  %v1201_v19 = vld [vmem:[#allocation7 + $0x80] ss:$16 sps:$4 sm:$0xff]   ;;  %v1202_v20 = vld [vmem:[#allocation7 + $0x88] ss:$16 sps:$4 sm:$0xff]   ;;  %vm107_vm1 = vcmask 175106   ;;  %vm400_vm3 = vcmask 1045504  }
  0x5f   :  { %417 = vmatprep.subr.bf16.mxu0 %v1185_v9  ;;  %458 = vmatprep.subr.bf16.mxu1 %v1187_v10  ;;  %v1203_v21 = vld [vmem:[#allocation7 + $0xa4] ss:$16 sps:$4 sm:$0xff]   ;;  %v1205_v22 = vld [vmem:[#allocation7 + $0xac] ss:$16 sps:$4 sm:$0xff]   ;;  %v1207_v23 = vld [vmem:[#allocation7 + $0xa0] ss:$16 sps:$4 sm:$0xff]  }
  0x60   :  { %v105_v24 = vld [vmem:[#allocation6] sm:$0xf]  ;;  %vm108_vm2 = vmor %vm107_vm1, %vm106_vm0  ;;  %v1208_v25 = vld [vmem:[#allocation7 + $0xa8] ss:$16 sps:$4 sm:$0xff]   ;;  %vm122_vm4 = vcmask 222384   ;;  %vm396_vm5 = vcmask 228352  }
  0x61   :  { %109 = vst.msk [vmem:[#allocation2] sm:$0xf] %vm108_vm2, %v105_v24  ;;  %v1209_v26 = vld [vmem:[#allocation7 + $0xc4] ss:$16 sps:$4 sm:$0xff]   ;;  %v1211_v27 = vld [vmem:[#allocation7 + $0xcc] ss:$16 sps:$4 sm:$0xff]  }
  0x62   :  { %418 = vmatpush1.bf16.msra.mxu0 %v1189_v11  ;;  %459 = vmatpush1.bf16.msra.mxu1 %v1190_v12  ;;  %v1213_v28 = vld [vmem:[#allocation7 + $0xc0] ss:$16 sps:$4 sm:$0xff]   ;;  %v1214_v29 = vld [vmem:[#allocation7 + $0xc8] ss:$16 sps:$4 sm:$0xff]   ;;  %v1215_v30 = vld [vmem:[#allocation7 + $0xe4] ss:$16 sps:$4 sm:$0xff]  }
  0x63   :  { %419 = vmatprep.subr.bf16.mxu0 %v1191_v13  ;;  %460 = vmatprep.subr.bf16.mxu1 %v1193_v14  ;;  %v1217_v31 = vld [vmem:[#allocation7 + $0xec] ss:$16 sps:$4 sm:$0xff]   ;;  %v1219_v32 = vld [vmem:[#allocation7 + $0xe0] ss:$16 sps:$4 sm:$0xff]   ;;  %v1220_v33 = vld [vmem:[#allocation7 + $0xe8] ss:$16 sps:$4 sm:$0xff]  }
  0x64   :  { %v1221_v34 = vld [vmem:[#allocation7 + $0x104] ss:$16 sps:$4 sm:$0xff]   ;;  %v1223_v35 = vld [vmem:[#allocation7 + $0x10c] ss:$16 sps:$4 sm:$0xff]   ;;  %v1225_v36 = vld [vmem:[#allocation7 + $0x100] ss:$16 sps:$4 sm:$0xff]  }
  0x65   :  { %v1227_v37 = vld [vmem:[#allocation7 + $0x124] ss:$16 sps:$4 sm:$0x3f]   ;;  %v1229_v38 = vld [vmem:[#allocation7 + $0x12c] ss:$16 sps:$4 sm:$0x3f]  }
  0x66   :  { %420 = vmatpush1.bf16.msra.mxu0 %v1195_v15  ;;  %461 = vmatpush1.bf16.msra.mxu1 %v1196_v16  ;;  %v1226_v39 = vld [vmem:[#allocation7 + $0x108] ss:$16 sps:$4 sm:$0xff]   ;;  %v1231_v40 = vld [vmem:[#allocation7 + $0x120] ss:$16 sps:$4 sm:$0x3f]   ;;  %vm1042_vm6 = vcmask 1024  }
  0x67   :  { %421 = vmatprep.subr.bf16.mxu0 %v1197_v17  ;;  %462 = vmatprep.subr.bf16.mxu1 %v1199_v18  ;;  %v1232_v41 = vld [vmem:[#allocation7 + $0x128] ss:$16 sps:$4 sm:$0x3f]   ;;  %v402_v42 = vsel %vm400_vm3, %v1231_v40, 0  ;;  %v1235_v43 = vld [vmem:[#allocation9 + $0x4] ss:$8 sps:$4 sm:$0xff]  }
  0x68   :  { %v408_v44 = vsel %vm400_vm3, %v1232_v41, 0  ;;  %v1238_v45 = vld [vmem:[#allocation10 + $0x4] ss:$8 sps:$4 sm:$0xff]   ;;  %v1233_v50 = vld [vmem:[#allocation9] ss:$8 sps:$4 sm:$0xff]  }
  0x69   :  { %v1236_v51 = vld [vmem:[#allocation10] ss:$8 sps:$4 sm:$0xff]   ;;  %v1241_v53 = vld [vmem:[#allocation9 + $0x14] ss:$8 sps:$4 sm:$0xff]   ;;  %v1239_v55 = vld [vmem:[#allocation9 + $0x10] ss:$8 sps:$4 sm:$0xff]  }
  0x6a   :  { %422 = vmatpush1.bf16.msra.mxu0 %v1201_v19  ;;  %463 = vmatpush1.bf16.msra.mxu1 %v1202_v20  ;;  %v1244_v54 = vld [vmem:[#allocation10 + $0x14] ss:$8 sps:$4 sm:$0xff]   ;;  %v1242_v56 = vld [vmem:[#allocation10 + $0x10] ss:$8 sps:$4 sm:$0xff]   ;;  %v1247_v57 = vld [vmem:[#allocation9 + $0x24] ss:$8 sps:$4 sm:$0xff]  }
  0x6b   :  { %423 = vmatprep.subr.bf16.mxu0 %v1203_v21  ;;  %464 = vmatprep.subr.bf16.mxu1 %v1205_v22  ;;  %v1250_v58 = vld [vmem:[#allocation10 + $0x24] ss:$8 sps:$4 sm:$0xff]   ;;  %v1245_v59 = vld [vmem:[#allocation9 + $0x20] ss:$8 sps:$4 sm:$0xff]   ;;  %v1253_v61 = vld [vmem:[#allocation9 + $0x34] ss:$8 sps:$4 sm:$0xff]  }
  0x6c   :  { %v1248_v60 = vld [vmem:[#allocation10 + $0x20] ss:$8 sps:$4 sm:$0xff]   ;;  %v1256_v62 = vld [vmem:[#allocation10 + $0x34] ss:$8 sps:$4 sm:$0xff]   ;;  %v1251_v63 = vld [vmem:[#allocation9 + $0x30] ss:$8 sps:$4 sm:$0xff]  }
  0x6d   :  { %v1254_v0 = vld [vmem:[#allocation10 + $0x30] ss:$8 sps:$4 sm:$0xff]   ;;  %v1259_v1 = vld [vmem:[#allocation9 + $0x44] ss:$8 sps:$4 sm:$0xff]   ;;  %v1257_v3 = vld [vmem:[#allocation9 + $0x40] ss:$8 sps:$4 sm:$0xff]  }
  0x6e   :  { %424 = vmatpush1.bf16.msra.mxu0 %v1207_v23  ;;  %465 = vmatpush1.bf16.msra.mxu1 %v1208_v25  ;;  %v1262_v2 = vld [vmem:[#allocation10 + $0x44] ss:$8 sps:$4 sm:$0xff]   ;;  %v1260_v4 = vld [vmem:[#allocation10 + $0x40] ss:$8 sps:$4 sm:$0xff]   ;;  %v1265_v5 = vld [vmem:[#allocation9 + $0x54] ss:$8 sps:$4 sm:$0xff]  }
  0x6f   :  { %425 = vmatprep.subr.bf16.mxu0 %v1209_v26  ;;  %466 = vmatprep.subr.bf16.mxu1 %v1211_v27  ;;  %v1268_v6 = vld [vmem:[#allocation10 + $0x54] ss:$8 sps:$4 sm:$0xff]   ;;  %v1263_v7 = vld [vmem:[#allocation9 + $0x50] ss:$8 sps:$4 sm:$0xff]   ;;  %v1271_v9 = vld [vmem:[#allocation9 + $0x64] ss:$8 sps:$4 sm:$0xff]  }
  0x70   :  { %v1266_v8 = vld [vmem:[#allocation10 + $0x50] ss:$8 sps:$4 sm:$0xff]   ;;  %v1274_v10 = vld [vmem:[#allocation10 + $0x64] ss:$8 sps:$4 sm:$0xff]   ;;  %v1269_v11 = vld [vmem:[#allocation9 + $0x60] ss:$8 sps:$4 sm:$0xff]  }
  0x71   :  { %v1272_v12 = vld [vmem:[#allocation10 + $0x60] ss:$8 sps:$4 sm:$0xff]   ;;  %v1277_v13 = vld [vmem:[#allocation9 + $0x74] ss:$8 sps:$4 sm:$0xff]   ;;  %v1275_v15 = vld [vmem:[#allocation9 + $0x70] ss:$8 sps:$4 sm:$0xff]  }
  0x72   :  { %426 = vmatpush1.bf16.msra.mxu0 %v1213_v28  ;;  %467 = vmatpush1.bf16.msra.mxu1 %v1214_v29  ;;  %v1280_v14 = vld [vmem:[#allocation10 + $0x74] ss:$8 sps:$4 sm:$0xff]   ;;  %v1278_v16 = vld [vmem:[#allocation10 + $0x70] ss:$8 sps:$4 sm:$0xff]   ;;  %v1283_v17 = vld [vmem:[#allocation9 + $0x84] ss:$8 sps:$4 sm:$0xff]  }
  0x73   :  { %427 = vmatprep.subr.bf16.mxu0 %v1215_v30  ;;  %468 = vmatprep.subr.bf16.mxu1 %v1217_v31  ;;  %v1286_v18 = vld [vmem:[#allocation10 + $0x84] ss:$8 sps:$4 sm:$0xff]   ;;  %v1281_v19 = vld [vmem:[#allocation9 + $0x80] ss:$8 sps:$4 sm:$0xff]   ;;  %v1289_v21 = vld [vmem:[#allocation9 + $0x94] ss:$8 sps:$4 sm:$0xff]  }
  0x74   :  { %v1284_v20 = vld [vmem:[#allocation10 + $0x80] ss:$8 sps:$4 sm:$0xff]   ;;  %v1292_v22 = vld [vmem:[#allocation10 + $0x94] ss:$8 sps:$4 sm:$0xff]   ;;  %v1287_v23 = vld [vmem:[#allocation9 + $0x90] ss:$8 sps:$4 sm:$0xff]  }
  0x75   :  { %v1290_v24 = vld [vmem:[#allocation10 + $0x90] ss:$8 sps:$4 sm:$0xff]   ;;  %v1295_v25 = vld [vmem:[#allocation9 + $0xa4] ss:$8 sps:$4 sm:$0xff]   ;;  %v1293_v27 = vld [vmem:[#allocation9 + $0xa0] ss:$8 sps:$4 sm:$0xff]  }
  0x76   :  { %428 = vmatpush1.bf16.msra.mxu0 %v1219_v32  ;;  %469 = vmatpush1.bf16.msra.mxu1 %v1220_v33  ;;  %v1298_v26 = vld [vmem:[#allocation10 + $0xa4] ss:$8 sps:$4 sm:$0xff]   ;;  %v1296_v28 = vld [vmem:[#allocation10 + $0xa0] ss:$8 sps:$4 sm:$0xff]   ;;  %v1301_v29 = vld [vmem:[#allocation9 + $0xb4] ss:$8 sps:$4 sm:$0xff]  }
  0x77   :  { %429 = vmatprep.subr.bf16.mxu0 %v1221_v34  ;;  %470 = vmatprep.subr.bf16.mxu1 %v1223_v35  ;;  %v1304_v30 = vld [vmem:[#allocation10 + $0xb4] ss:$8 sps:$4 sm:$0xff]   ;;  %v1299_v31 = vld [vmem:[#allocation9 + $0xb0] ss:$8 sps:$4 sm:$0xff]   ;;  %v1307_v33 = vld [vmem:[#allocation9 + $0xc4] ss:$8 sps:$4 sm:$0xff]  }
  0x78   :  { %v1302_v32 = vld [vmem:[#allocation10 + $0xb0] ss:$8 sps:$4 sm:$0xff]   ;;  %v1310_v34 = vld [vmem:[#allocation10 + $0xc4] ss:$8 sps:$4 sm:$0xff]   ;;  %v1305_v35 = vld [vmem:[#allocation9 + $0xc0] ss:$8 sps:$4 sm:$0xff]  }
  0x79   :  { %v1314_v40 = vld [vmem:[#allocation10 + $0xd0] ss:$8 sps:$4 sm:$0xff]   ;;  %v1319_v41 = vld [vmem:[#allocation9 + $0xe4] ss:$8 sps:$4 sm:$0xff]  }
  0x7a   :  { %430 = vmatpush1.bf16.msra.mxu0 %v1225_v36  ;;  %471 = vmatpush1.bf16.msra.mxu1 %v1226_v39  ;;  %v1308_v36 = vld [vmem:[#allocation10 + $0xc0] ss:$8 sps:$4 sm:$0xff]   ;;  %v1311_v39 = vld [vmem:[#allocation9 + $0xd0] ss:$8 sps:$4 sm:$0xff]  }
  0x7b   :  { %1094 = vmatprep.subr.msk.bf16.mxu0 %vm400_vm3, %v1227_v37  ;;  %1096 = vmatprep.subr.msk.bf16.mxu1 %vm400_vm3, %v1229_v38  ;;  %v1313_v37 = vld [vmem:[#allocation9 + $0xd4] ss:$8 sps:$4 sm:$0xff]  }
  0x7c   :  { %v1316_v38 = vld [vmem:[#allocation10 + $0xd4] ss:$8 sps:$4 sm:$0xff]  }
  0x7e   :  { %432 = vmatpush1.bf16.msra.mxu0 %v402_v42  ;;  %473 = vmatpush1.bf16.msra.mxu1 %v408_v44  ;;  %v1322_v42 = vld [vmem:[#allocation10 + $0xe4] ss:$8 sps:$4 sm:$0xff]   ;;  %v1320_v44 = vld [vmem:[#allocation10 + $0xe0] ss:$8 sps:$4 sm:$0xff]  }
  0x7f   :  { %708 = vmatprep.subr.bf16.mxu0 %v1235_v43  ;;  %977 = vmatprep.subr.bf16.mxu1 %v1238_v45  ;;  %v1317_v43 = vld [vmem:[#allocation9 + $0xe0] ss:$8 sps:$4 sm:$0xff]   ;;  %v1325_v45 = vld [vmem:[#allocation9 + $0xf4] ss:$8 sps:$4 sm:$0xff]  }
  0xca   :  { %v120_v46 = vpop.permute.xlu0 %119 }
  0xcb   :  { %123 = vst.msk [vmem:[#allocation2 + $0x2] sm:$0x3] %vm122_vm4, %v120_v46  ;;  %v1328_v46 = vld [vmem:[#allocation10 + $0xf4] ss:$8 sps:$4 sm:$0xff]  }
  0xd2   :  { %v1053_v47 = vld.sshfl [vmem:[#allocation2] sm:$0x33 pattern:$0x76325410] }
  0xd3   :  { %v133_v48 = vcombine.high %v1053_v47, %v1053_v47  ;;  %v136_v52 = vpack.c.bf16 %v1053_v47, %v1053_v47  ;;  %v1323_v47 = vld [vmem:[#allocation9 + $0xf0] ss:$8 sps:$4 sm:$0xff]  }
  0xd5   :  { %v137_v49 = vpack.c.bf16 %v133_v48, %v133_v48  ;;  %v1326_v48 = vld [vmem:[#allocation10 + $0xf0] ss:$8 sps:$4 sm:$0xff]  }
  0xd7   :  { %1095 = vmatprep.mubr.msk.bf16.mxu0 %vm396_vm5, %v137_v49  ;;  %1097 = vmatprep.mubr.msk.bf16.mxu1 %vm396_vm5, %v137_v49  ;;  %v180_v49 = vlaneseq }
  0xd8   :  { %446 = vmatmul.mubr.bf16.vlgmr.msra.gmra.mrb[0].mxu0 %v136_v52  ;;  %487 = vmatmul.mubr.bf16.vlgmr.msra.gmra.mrb[0].mxu1 %v136_v52 }
  0xd9   :  { %709 = vmatpush1.bf16.msra.mxu0 %v1233_v50  ;;  %978 = vmatpush1.bf16.msra.mxu1 %v1236_v51  ;;  %v181_v50 = vshrl.u32 %v180_v49, 7 }
  0xda   :  { %710 = vmatprep.subr.bf16.mxu0 %v1241_v53  ;;  %979 = vmatprep.subr.bf16.mxu1 %v1244_v54  ;;  %v178_v53 = vld [vmem:[%s1602_s4] sm:$0xf] }
  0xdb   :  { %v1569_v51 = vsub.s32 0, %v181_v50  ;;  %v190_v52 = vsub.s32 2, %v181_v50  ;;  %v186_v54 = vsub.s32 1, %v181_v50 }
  0xdd   :  { %711 = vmatpush1.bf16.msra.mxu0 %v1239_v55  ;;  %980 = vmatpush1.bf16.msra.mxu1 %v1242_v56  ;;  %v194_v55 = vsub.s32 3, %v181_v50  ;;  %v183_v56 = vrot.slane %v178_v53, %v1569_v51 }
  0xde   :  { %712 = vmatprep.subr.bf16.mxu0 %v1247_v57  ;;  %981 = vmatprep.subr.bf16.mxu1 %v1250_v58  ;;  %v191_v57 = vrot.slane %v178_v53, %v190_v52  ;;  %v187_v58 = vrot.slane %v178_v53, %v186_v54 }
  0xe1   :  { %713 = vmatpush1.bf16.msra.mxu0 %v1245_v59  ;;  %982 = vmatpush1.bf16.msra.mxu1 %v1248_v60  ;;  %v195_v59 = vrot.slane %v178_v53, %v194_v55 }
  0xe2   :  { %714 = vmatprep.subr.bf16.mxu0 %v1253_v61  ;;  %983 = vmatprep.subr.bf16.mxu1 %v1256_v62 }
  0xe5   :  { %715 = vmatpush1.bf16.msra.mxu0 %v1251_v63  ;;  %984 = vmatpush1.bf16.msra.mxu1 %v1254_v0 }
  0xe6   :  { %716 = vmatprep.subr.bf16.mxu0 %v1259_v1  ;;  %985 = vmatprep.subr.bf16.mxu1 %v1262_v2 }
  0xe9   :  { %717 = vmatpush1.bf16.msra.mxu0 %v1257_v3  ;;  %986 = vmatpush1.bf16.msra.mxu1 %v1260_v4 }
  0xea   :  { %718 = vmatprep.subr.bf16.mxu0 %v1265_v5  ;;  %987 = vmatprep.subr.bf16.mxu1 %v1268_v6 }
  0xed   :  { %719 = vmatpush1.bf16.msra.mxu0 %v1263_v7  ;;  %988 = vmatpush1.bf16.msra.mxu1 %v1266_v8 }
  0xee   :  { %720 = vmatprep.subr.bf16.mxu0 %v1271_v9  ;;  %989 = vmatprep.subr.bf16.mxu1 %v1274_v10 }
  0xf1   :  { %721 = vmatpush1.bf16.msra.mxu0 %v1269_v11  ;;  %990 = vmatpush1.bf16.msra.mxu1 %v1272_v12 }
  0xf2   :  { %722 = vmatprep.subr.bf16.mxu0 %v1277_v13  ;;  %991 = vmatprep.subr.bf16.mxu1 %v1280_v14 }
  0xf5   :  { %723 = vmatpush1.bf16.msra.mxu0 %v1275_v15  ;;  %992 = vmatpush1.bf16.msra.mxu1 %v1278_v16  ;;  %v536_v16 = vld [vmem:[%s1604_s6] sm:$0x3]  ;;  %s1130_s6 = sld [smem:[#allocation3 + $0x1]] }
  0xf6   :  { %724 = vmatprep.subr.bf16.mxu0 %v1283_v17  ;;  %993 = vmatprep.subr.bf16.mxu1 %v1286_v18  ;;  %v805_v17 = vld [vmem:[%s1607_s9] sm:$0x3]  ;;  %v541_v18 = vrot.slane %v536_v16, %v1569_v51 }
  0xf9   :  { %725 = vmatpush1.bf16.msra.mxu0 %v1281_v19  ;;  %994 = vmatpush1.bf16.msra.mxu1 %v1284_v20  ;;  %v810_v19 = vrot.slane %v805_v17, %v1569_v51  ;;  %v751_v20 = vld [vmem:[%s1605_s7] sm:$0x3]  ;;  %s503_s7 = sld [smem:[#allocation3]] }
  0xfa   :  { %726 = vmatprep.subr.bf16.mxu0 %v1289_v21  ;;  %995 = vmatprep.subr.bf16.mxu1 %v1292_v22  ;;  %v545_v21 = vrot.slane %v536_v16, %v186_v54  ;;  %v814_v22 = vrot.slane %v805_v17, %v186_v54 }
  0xfd   :  { %727 = vmatpush1.bf16.msra.mxu0 %v1287_v23  ;;  %996 = vmatpush1.bf16.msra.mxu1 %v1290_v24  ;;  %v1020_v23 = vld [vmem:[%s1608_s10] sm:$0x3] }
  0xfe   :  { %728 = vmatprep.subr.bf16.mxu0 %v1295_v25  ;;  %997 = vmatprep.subr.bf16.mxu1 %v1298_v26 }
  0xff   :  { %v770_v55 = vstv %s503_s7 }
 0x101   :  { %729 = vmatpush1.bf16.msra.mxu0 %v1293_v27  ;;  %998 = vmatpush1.bf16.msra.mxu1 %v1296_v28  ;;  %v756_v27 = vrot.slane %v751_v20, %v1569_v51 }
 0x102   :  { %730 = vmatprep.subr.bf16.mxu0 %v1301_v29  ;;  %999 = vmatprep.subr.bf16.mxu1 %v1304_v30 }
 0x105   :  { %731 = vmatpush1.bf16.msra.mxu0 %v1299_v31  ;;  %1000 = vmatpush1.bf16.msra.mxu1 %v1302_v32  ;;  %v1025_v31 = vrot.slane %v1020_v23, %v1569_v51 }
 0x106   :  { %732 = vmatprep.subr.bf16.mxu0 %v1307_v33  ;;  %1001 = vmatprep.subr.bf16.mxu1 %v1310_v34  ;;  %v760_v33 = vrot.slane %v751_v20, %v186_v54 }
 0x109   :  { %733 = vmatpush1.bf16.msra.mxu0 %v1305_v35  ;;  %1002 = vmatpush1.bf16.msra.mxu1 %v1308_v36 }
 0x10a   :  { %734 = vmatprep.subr.bf16.mxu0 %v1313_v37  ;;  %1003 = vmatprep.subr.bf16.mxu1 %v1316_v38  ;;  %v1029_v37 = vrot.slane %v1020_v23, %v186_v54  ;;  %v1039_v54 = vstv %s1130_s6 }
 0x10d   :  { %735 = vmatpush1.bf16.msra.mxu0 %v1311_v39  ;;  %1004 = vmatpush1.bf16.msra.mxu1 %v1314_v40 }
 0x10e   :  { %736 = vmatprep.subr.bf16.mxu0 %v1319_v41  ;;  %1005 = vmatprep.subr.bf16.mxu1 %v1322_v42 }
 0x111   :  { %737 = vmatpush1.bf16.msra.mxu0 %v1317_v43  ;;  %1006 = vmatpush1.bf16.msra.mxu1 %v1320_v44 }
 0x112   :  { %738 = vmatprep.subr.bf16.mxu0 %v1325_v45  ;;  %1007 = vmatprep.subr.bf16.mxu1 %v1328_v46 }
 0x115   :  { %739 = vmatpush1.bf16.msra.mxu0 %v1323_v47  ;;  %1008 = vmatpush1.bf16.msra.mxu1 %v1326_v48 }
 0x1ab   :  { %v447_v60 = vpop.f32.mrb[0].mxu0  ;;  %v488_v61 = vpop.f32.mrb[0].mxu1 }
 0x1ac   :  { %v448_v62 = vadd.f32 %v447_v60, %v183_v56  ;;  %v489_v63 = vadd.f32 %v488_v61, %v191_v57  ;;  %v449_v0 = vpop.f32.mrb[1].mxu0  ;;  %v490_v1 = vpop.f32.mrb[1].mxu1 }
 0x1ad   :  { %v450_v2 = vadd.f32 %v449_v0, %v187_v58  ;;  %v491_v3 = vadd.f32 %v490_v1, %v195_v59  ;;  %v451_v4 = vpop.f32.mrb[2].mxu0  ;;  %v492_v5 = vpop.f32.mrb[2].mxu1 }
 0x1ae   :  { %v495_v6 = vmax.f32 %v448_v62, 0.0  ;;  %v497_v7 = vmax.f32 %v489_v63, 0.0  ;;  %v452_v8 = vpop.f32.mrb[3].mxu0  ;;  %v493_v9 = vpop.f32.mrb[3].mxu1 }
 0x1af   :  { %v496_v10 = vmax.f32 %v450_v2, 0.0  ;;  %v498_v11 = vmax.f32 %v491_v3, 0.0 }
 0x1b0   :  { %v499_v14 = vpack.c.bf16 %v495_v6, %v495_v6  ;;  %v501_v15 = vpack.c.bf16 %v497_v7, %v497_v7 }
 0x1b1   :  { %v500_v12 = vpack.c.bf16 %v496_v10, %v496_v10  ;;  %v502_v13 = vpack.c.bf16 %v498_v11, %v498_v11 }
 0x1b3   :  { %740 = vmatprep.mubr.bf16.mxu0 %v500_v12  ;;  %1009 = vmatprep.mubr.bf16.mxu1 %v502_v13 }
 0x1b4   :  { %741 = vmatmul.mubr.bf16.vlgmr.msra.gmra.mrb[4].mxu0 %v499_v14  ;;  %1010 = vmatmul.mubr.bf16.vlgmr.msra.gmra.mrb[4].mxu1 %v501_v15 }
 0x287   :  { %v742_v24 = vpop.f32.mrb[4].mxu0  ;;  %v1011_v25 = vpop.f32.mrb[4].mxu1 }
 0x288   :  { %v743_v26 = vadd.f32 %v742_v24, %v541_v18  ;;  %v1012_v28 = vadd.f32 %v1011_v25, %v810_v19  ;;  %v744_v29 = vpop.f32.mrb[5].mxu0  ;;  %v1013_v30 = vpop.f32.mrb[5].mxu1 }
 0x289   :  { %v745_v32 = vadd.f32 %v744_v29, %v545_v21  ;;  %v1014_v34 = vadd.f32 %v1013_v30, %v814_v22  ;;  %v746_v35 = vpop.f32.mrb[6].mxu0  ;;  %v1015_v36 = vpop.f32.mrb[6].mxu1 }
 0x28a   :  { %v749_v38 = vmax.f32 %v743_v26, 0.0  ;;  %v1018_v39 = vmax.f32 %v1012_v28, 0.0  ;;  %v747_v40 = vpop.f32.mrb[7].mxu0  ;;  %v1016_v41 = vpop.f32.mrb[7].mxu1 }
 0x28b   :  { %v750_v42 = vmax.f32 %v745_v32, 0.0  ;;  %v1019_v43 = vmax.f32 %v1014_v34, 0.0 }
 0x28c   :  { %v763_v44 = vmul.f32 %v756_v27, %v749_v38  ;;  %v1032_v45 = vmul.f32 %v1025_v31, %v1018_v39 }
 0x28d   :  { %v764_v46 = vmul.f32 %v760_v33, %v750_v42  ;;  %v1033_v47 = vmul.f32 %v1029_v37, %v1019_v43 }
 0x28e   :  { %v1034_v48 = vsel %vm106_vm0, %v1032_v45, 0.0  ;;  %v765_v49 = vsel %vm106_vm0, %v763_v44, 0.0 }
 0x28f   :  { %v1035_v50 = vsel %vm106_vm0, %v1033_v47, 0.0  ;;  %v766_v51 = vsel %vm106_vm0, %v764_v46, 0.0 }
 0x290   :  { %v1036_v52 = vadd.f32 %v1035_v50, %v1034_v48  ;;  %v767_v53 = vadd.f32 %v766_v51, %v765_v49 }
 0x292   :  { %1037 = vadd.xlane.f32.xlu1 %v1036_v52  ;;  %768 = vadd.xlane.f32.xlu0 %v767_v53 }
 0x31f   :  { %v1038_v56 = vpop.xlane.xlu1 %1037  ;;  %v769_v57 = vpop.xlane.xlu0 %768 }
 0x320   :  { %v1040_v58 = vadd.f32 %v1039_v54, %v1038_v56  ;;  %v771_v59 = vadd.f32 %v770_v55, %v769_v57 }
 0x322   :  { %v1041_v60 = vmin.f32 %v771_v59, %v1040_v58 }
 0x324   :  { %1043 = vst.msk [vmem:[%s1609_s11] sm:$0x3] %vm1042_vm6, %v1041_v60 }
 0x325   :  { %1048 = vsyncpa [#allocation4], 1 }
 0x326   :  { %1049 = vsyncpa [#allocation8], 1 }
 0x327   :  { %1050 = vsyncpa [#allocation11], 1 }
 0x328   :  { %1051 = vsyncpa [#allocation5], 1 }

</bundles_post_ra>
